<compile_context>
chip_gen: v5e
topology: v5e:2x2
jax: 0.10.0
libtpu: 0.0.40
codegen_flags: <defaults>
</compile_context>

<pallas_src>
import functools
import math

import jax
import jax.numpy as jnp
from jax.experimental import pallas as pl
from jax.experimental.pallas import tpu as pltpu


def _round_up(x, m):
    return ((x + m - 1) // m) * m


# ----------------------------- Pallas kernels -------------------------------

def _mm_bias_act_kernel(a_ref, w_ref, b_ref, *rest, act, has_identity):
    """act(A @ W + bias [+ identity]) for one (tm, tn) output tile."""
    if has_identity:
        id_ref, o_ref = rest
    else:
        (o_ref,) = rest
    acc = jnp.dot(a_ref[...], w_ref[...], preferred_element_type=jnp.float32)
    acc = acc + b_ref[...]
    if has_identity:
        acc = acc + id_ref[...]          # residual branch, fused epilogue
    if act == "relu":
        acc = jnp.maximum(acc, 0.0)
    elif act == "tanh":
        acc = jnp.tanh(acc)
    o_ref[...] = acc.astype(o_ref.dtype)


def matmul_bias_act(a, w, b, act="none", identity=None,
                    out_dtype=jnp.bfloat16):
    """out = act(a @ w + b [+ identity]).

    2-D parallel grid over (M, N); A/W fed to the MXU in bf16, f32 epilogue.
    """
    M, K = a.shape
    N = w.shape[1]
    a = a.astype(jnp.bfloat16)
    w = w.astype(jnp.bfloat16)
    b = b.astype(jnp.float32).reshape(1, N)

    if N >= 256:
        tn = 256
    elif N >= 128:
        tn = 128
    else:
        tn = N                      # small Cout: full-dim block, no pad copy
    tm = 256 if M >= 256 else M
    Mp = _round_up(M, tm)
    Np = _round_up(N, tn)

    if Mp != M:
        a = jnp.pad(a, ((0, Mp - M), (0, 0)))
    if Np != N:
        w = jnp.pad(w, ((0, 0), (0, Np - N)))
        b = jnp.pad(b, ((0, 0), (0, Np - N)))

    inputs = [a, w, b]
    in_specs = [
        pl.BlockSpec((tm, K), lambda i, j: (i, 0)),
        pl.BlockSpec((K, tn), lambda i, j: (0, j)),
        pl.BlockSpec((1, tn), lambda i, j: (0, j)),
    ]
    has_identity = identity is not None
    if has_identity:
        idm = identity
        if idm.shape != (Mp, Np):
            idm = jnp.pad(idm, ((0, Mp - M), (0, Np - N)))
        inputs.append(idm)
        in_specs.append(pl.BlockSpec((tm, tn), lambda i, j: (i, j)))

    out = pl.pallas_call(
        functools.partial(_mm_bias_act_kernel, act=act,
                          has_identity=has_identity),
        out_shape=jax.ShapeDtypeStruct((Mp, Np), out_dtype),
        grid=(Mp // tm, Np // tn),
        in_specs=in_specs,
        out_specs=pl.BlockSpec((tm, tn), lambda i, j: (i, j)),
        compiler_params=pltpu.CompilerParams(
            dimension_semantics=("parallel", "parallel"),
            vmem_limit_bytes=32 * 1024 * 1024),
    )(*inputs)
    if Mp != M or Np != N:
        out = out[:M, :N]
    return out


def _maxpool_kernel(ee_ref, eo_ref, oe_ref, oo_ref, o_ref):
    """3x3/s2 max-pool from the four (row,col)-parity planes (read once)."""
    Ho, Wo = o_ref.shape[1], o_ref.shape[2]
    ee = ee_ref[...]
    eo = eo_ref[...]
    oe = oe_ref[...]
    oo = oo_ref[...]
    m = ee[:, :Ho, :Wo]
    m = jnp.maximum(m, ee[:, :Ho, 1:Wo + 1])
    m = jnp.maximum(m, ee[:, 1:Ho + 1, :Wo])
    m = jnp.maximum(m, ee[:, 1:Ho + 1, 1:Wo + 1])
    m = jnp.maximum(m, eo[:, :Ho, :Wo])
    m = jnp.maximum(m, eo[:, 1:Ho + 1, :Wo])
    m = jnp.maximum(m, oe[:, :Ho, :Wo])
    m = jnp.maximum(m, oe[:, :Ho, 1:Wo + 1])
    m = jnp.maximum(m, oo[:, :Ho, :Wo])
    o_ref[...] = m


def _ggnn_kernel(x_ref, c_ref, d_ref,
                 wphi, wi_c, bi,
                 wa_h, wa_d, ba,
                 wih, bih, whh, bhh,
                 wo0, woT, bo, baux,
                 final_ref, aux_ref,
                 *, max_steps, h_dim, x_dim, num_tasks, inv_hw):
    """avgpool + initializer + max_steps x (aggregator + GRUCell)
    + output_model + aux_fc, fused."""
    f32 = jnp.float32

    # fused global average pool: phi_o = mean over H*W of the feature map
    phi = jnp.sum(x_ref[...].astype(f32), axis=1) * inv_hw        # [B, 2048]
    c = c_ref[...]
    d = d_ref[...]

    # one wide matmul covering every phi_o-consuming projection
    # columns: [wi_p | wa_p | waux]
    pw = jnp.dot(phi, wphi[...], preferred_element_type=f32)      # [B, h+x+T]
    phi_wi = pw[:, 0:h_dim]
    phi_wa = pw[:, h_dim:h_dim + x_dim]
    aux = pw[:, h_dim + x_dim:h_dim + x_dim + num_tasks] + baux[...]

    # initializer: h_0 = tanh(W_i [phi_o ; c] + b_i)
    h0 = jnp.tanh(phi_wi
                  + jnp.dot(c, wi_c[...], preferred_element_type=f32)
                  + bi[...])

    # aggregator contribution independent of h_t (hoisted out of the loop)
    agg_const = phi_wa + d * wa_d[...] + ba[...]

    w_ih = wih[...]; b_ih = bih[...]
    w_hh = whh[...]; b_hh = bhh[...]

    h = h0
    for _ in range(max_steps):
        # aggregator: x_t = tanh(W_a [h_t ; phi_o ; d] + b_a)
        x_t = jnp.tanh(
            jnp.dot(h, wa_h[...], preferred_element_type=f32) + agg_const)
        # nn.GRUCell (PyTorch gate order r, z, n)
        gi = jnp.dot(x_t, w_ih, preferred_element_type=f32) + b_ih
        gh = jnp.dot(h, w_hh, preferred_element_type=f32) + b_hh
        r = jax.nn.sigmoid(gi[:, 0:h_dim] + gh[:, 0:h_dim])
        z = jax.nn.sigmoid(gi[:, h_dim:2 * h_dim] + gh[:, h_dim:2 * h_dim])
        n = jnp.tanh(gi[:, 2 * h_dim:3 * h_dim]
                     + r * gh[:, 2 * h_dim:3 * h_dim])
        h = (1.0 - z) * n + z * h
    hT = h

    # output_model: final_logits = W_o [h_0 ; h_T] + b_o
    final_ref[...] = (jnp.dot(h0, wo0[...], preferred_element_type=f32)
                      + jnp.dot(hT, woT[...], preferred_element_type=f32)
                      + bo[...])
    # aux head: aux_fc(drop(phi_o)), dropout = identity in eval mode
    aux_ref[...] = aux


# --------------------------- ResNet-101 extractor ---------------------------

def im2col(x, kh, kw, stride, pad):
    if kh == 1 and kw == 1 and stride == 1 and pad == 0:
        B, H, W, C = x.shape
        return x.reshape(B * H * W, C), (B, H, W)
    if pad:
        x = jnp.pad(x, ((0, 0), (pad, pad), (pad, pad), (0, 0)))
    B, H, W, C = x.shape
    Ho = (H - kh) // stride + 1
    Wo = (W - kw) // stride + 1
    views = [x[:, i:i + stride * Ho:stride, j:j + stride * Wo:stride, :]
             for i in range(kh) for j in range(kw)]
    patches = jnp.stack(views, axis=3)           # [B, Ho, Wo, kh*kw, C]
    return patches.reshape(B * Ho * Wo, kh * kw * C), (B, Ho, Wo)


def conv_bn_act(x, p, kh, kw, stride, pad, act, identity=None):
    # eval-mode BatchNorm folded into the conv (conv has no bias in ResNet)
    scale = p["gamma"] / jnp.sqrt(p["var"] + 1e-5)
    w_eff = p["w"] * scale[None, :]
    b_eff = p["beta"] - p["mean"] * scale
    cols, (B, Ho, Wo) = im2col(x, kh, kw, stride, pad)
    if identity is not None:
        identity = identity.reshape(B * Ho * Wo, -1)
    y = matmul_bias_act(cols, w_eff, b_eff, act=act, identity=identity)
    return y.reshape(B, Ho, Wo, -1)


def maxpool3x3s2(x):
    """PyTorch MaxPool2d(kernel_size=3, stride=2, padding=1), NHWC."""
    B, H, W, C = x.shape
    Ho = (H - 1) // 2 + 1
    Wo = (W - 1) // 2 + 1
    Hp = 2 * Ho + 2
    Wp = 2 * Wo + 2
    xp = jnp.pad(x, ((0, 0), (1, Hp - H - 1), (1, Wp - W - 1), (0, 0)),
                 constant_values=float("-inf"))
    # four parity planes, each [B, Ho+1, Wo+1, C]; total bytes ~ one copy of x
    ee = xp[:, 0::2, 0::2, :]
    eo = xp[:, 0::2, 1::2, :]
    oe = xp[:, 1::2, 0::2, :]
    oo = xp[:, 1::2, 1::2, :]
    return pl.pallas_call(
        _maxpool_kernel,
        out_shape=jax.ShapeDtypeStruct((B, Ho, Wo, C), x.dtype),
    )(ee, eo, oe, oo)


def bottleneck(x, blk):
    s = blk["stride"]
    out = conv_bn_act(x, blk["conv1"], 1, 1, 1, 0, "relu")
    out = conv_bn_act(out, blk["conv2"], 3, 3, s, 1, "relu")
    if "down" in blk:
        identity = conv_bn_act(x, blk["down"], 1, 1, s, 0, "none")
    else:
        identity = x
    # conv3 with the residual add + ReLU fused into its matmul epilogue
    return conv_bn_act(out, blk["conv3"], 1, 1, 1, 0, "relu",
                       identity=identity)


def resnet_extractor(p, o_nchw):
    # NCHW -> NHWC, bf16 activations throughout the conv stack
    x = jnp.transpose(o_nchw, (0, 2, 3, 1)).astype(jnp.bfloat16)
    x = conv_bn_act(x, p["stem"], 7, 7, 2, 3, "relu")
    x = maxpool3x3s2(x)
    for layer in p["layers"]:
        for blk in layer:
            x = bottleneck(x, blk)
    return x      # [B, H, W, 2048]; the avgpool is fused into the GGNN kernel


# ------------------------------ parameter init ------------------------------

def _init_conv_bn(key, kh, kw, cin, cout):
    fan_in = kh * kw * cin
    w = jax.random.normal(key, (kh * kw * cin, cout),
                          jnp.float32) / math.sqrt(fan_in)
    return {"w": w,
            "gamma": jnp.ones((cout,), jnp.float32),
            "beta": jnp.zeros((cout,), jnp.float32),
            "mean": jnp.zeros((cout,), jnp.float32),
            "var": jnp.ones((cout,), jnp.float32)}


def init_resnet101(key):
    layers_cfg = [(64, 3, 1), (128, 4, 2), (256, 23, 2), (512, 3, 2)]
    n_convs = 1 + sum(3 * n + 1 for _, n, _ in layers_cfg)
    keys = iter(jax.random.split(key, n_convs))
    params = {"stem": _init_conv_bn(next(keys), 7, 7, 3, 64), "layers": []}
    inplanes = 64
    for planes, nblocks, stride in layers_cfg:
        layer = []
        for bi in range(nblocks):
            s = stride if bi == 0 else 1
            blk = {"conv1": _init_conv_bn(next(keys), 1, 1, inplanes, planes),
                   "conv2": _init_conv_bn(next(keys), 3, 3, planes, planes),
                   "conv3": _init_conv_bn(next(keys), 1, 1, planes, planes * 4),
                   "stride": s}
            if s != 1 or inplanes != planes * 4:
                blk["down"] = _init_conv_bn(next(keys), 1, 1, inplanes,
                                            planes * 4)
            layer.append(blk)
            inplanes = planes * 4
        params["layers"].append(layer)
    return params


def init_ggnn_params(key, feat_dim, class_dim, h_dim, x_dim, num_tasks):
    ks = jax.random.split(key, 16)

    def u(k, shape, bound):
        return jax.random.uniform(k, shape, jnp.float32, -bound, bound)

    b_init = 1.0 / math.sqrt(feat_dim + class_dim)
    b_agg = 1.0 / math.sqrt(h_dim + feat_dim + 1)
    b_gru = 1.0 / math.sqrt(h_dim)
    b_out = 1.0 / math.sqrt(2 * h_dim)
    b_aux = 1.0 / math.sqrt(feat_dim)
    return {
        "wi_p": u(ks[0], (feat_dim, h_dim), b_init),
        "wi_c": u(ks[1], (class_dim, h_dim), b_init),
        "bi":   u(ks[2], (1, h_dim), b_init),
        "wa_h": u(ks[3], (h_dim, x_dim), b_agg),
        "wa_p": u(ks[4], (feat_dim, x_dim), b_agg),
        "wa_d": u(ks[5], (1, x_dim), b_agg),
        "ba":   u(ks[6], (1, x_dim), b_agg),
        "wih":  u(ks[7], (x_dim, 3 * h_dim), b_gru),
        "bih":  u(ks[8], (1, 3 * h_dim), b_gru),
        "whh":  u(ks[9], (h_dim, 3 * h_dim), b_gru),
        "bhh":  u(ks[10], (1, 3 * h_dim), b_gru),
        "wo0":  u(ks[11], (h_dim, num_tasks), b_out),
        "woT":  u(ks[12], (h_dim, num_tasks), b_out),
        "bo":   u(ks[13], (1, num_tasks), b_out),
        "waux": u(ks[14], (feat_dim, num_tasks), b_aux),
        "baux": u(ks[15], (1, num_tasks), b_aux),
    }


# ------------------------------- full forward -------------------------------

def ggnn_disc_loss_forward(resnet_params, gp, o, c, d, *,
                           max_steps, h_dim, x_dim, num_tasks):
    feat = resnet_extractor(resnet_params, o)            # [B, H, W, 2048]
    B, H, W, C = feat.shape
    feat = feat.reshape(B, H * W, C)

    # one concatenated weight for every phi_o projection: [wi_p | wa_p | waux]
    w_phi = jnp.concatenate([gp["wi_p"], gp["wa_p"], gp["waux"]], axis=1)

    kernel = functools.partial(
        _ggnn_kernel, max_steps=max_steps, h_dim=h_dim, x_dim=x_dim,
        num_tasks=num_tasks, inv_hw=1.0 / float(H * W))
    out_shape = (jax.ShapeDtypeStruct((B, num_tasks), jnp.float32),
                 jax.ShapeDtypeStruct((B, num_tasks), jnp.float32))
    final_logits, aux_logits = pl.pallas_call(kernel, out_shape=out_shape)(
        feat, c.astype(jnp.float32), d.astype(jnp.float32),
        w_phi, gp["wi_c"], gp["bi"],
        gp["wa_h"], gp["wa_d"], gp["ba"],
        gp["wih"], gp["bih"], gp["whh"], gp["bhh"],
        gp["wo0"], gp["woT"], gp["bo"], gp["baux"])
    return final_logits, aux_logits


# ----------------------------------- main ------------------------------------

if __name__ == "__main__":
    B, H, W = 2, 64, 64
    class_dim, h_dim, x_dim = 90, 128, 128
    num_tasks, max_steps = 14, 3

    key = jax.random.PRNGKey(0)
    k_res, k_ggnn, k_o, k_c, k_d = jax.random.split(key, 5)

    resnet_params = init_resnet101(k_res)
    ggnn_params = init_ggnn_params(k_ggnn, 2048, class_dim, h_dim, x_dim,
                                   num_tasks)

    o = jax.random.normal(k_o, (B, 3, H, W), jnp.float32)
    cls = jax.random.randint(k_c, (B,), 0, class_dim)
    c = jax.nn.one_hot(cls, class_dim, dtype=jnp.float32)
    d = jax.random.uniform(k_d, (B, 1), jnp.float32)

    final_logits, aux_logits = ggnn_disc_loss_forward(
        resnet_params, ggnn_params, o, c, d,
        max_steps=max_steps, h_dim=h_dim, x_dim=x_dim, num_tasks=num_tasks)
    jax.block_until_ready((final_logits, aux_logits))

    assert final_logits.shape == (B, num_tasks)
    assert aux_logits.shape == (B, num_tasks)
    assert bool(jnp.all(jnp.isfinite(final_logits)))
    assert bool(jnp.all(jnp.isfinite(aux_logits)))
    print("KERNEL_OK")
</pallas_src>

<mosaic_0001>
module attributes {stable_mosaic.version = 11 : i64} {
  func.func @_mm_bias_act_kernel(%arg0: i32, %arg1: i32, %arg2: memref<256x147xbf16, #tpu.memory_space<vmem>>, %arg3: memref<147x64xbf16, #tpu.memory_space<vmem>>, %arg4: memref<1x64xf32, #tpu.memory_space<vmem>>, %arg5: memref<256x64xbf16, #tpu.memory_space<vmem>>) attributes {dimension_semantics = [#tpu.dimension_semantics<parallel>, #tpu.dimension_semantics<parallel>], iteration_bounds = array<i64: 8, 1>, scalar_prefetch = 0 : i64, scratch_operands = 0 : i64, tpu.core_type = #tpu.core_type<tc>, window_params = [{transform_indices = @transform_0, window_bounds = array<i64: 256, 147>}, {transform_indices = @transform_1, window_bounds = array<i64: 147, 64>}, {transform_indices = @transform_2, window_bounds = array<i64: 1, 64>}, {transform_indices = @transform_3, window_bounds = array<i64: 256, 64>}]} {
    %c0 = arith.constant 0 : index
    %c0_0 = arith.constant 0 : index
    %0 = vector.load %arg2[%c0, %c0_0] : memref<256x147xbf16, #tpu.memory_space<vmem>>, vector<256x147xbf16>
    %c0_1 = arith.constant 0 : index
    %c0_2 = arith.constant 0 : index
    %1 = vector.load %arg3[%c0_1, %c0_2] : memref<147x64xbf16, #tpu.memory_space<vmem>>, vector<147x64xbf16>
    %cst = arith.constant dense<0.000000e+00> : vector<256x64xf32>
    %2 = tpu.matmul %0, %1, %cst {dimension_numbers = #tpu.dot_dimension_numbers<[1], [0], [0], [1], [0, 0, 1, 1], [], []>} : vector<256x147xbf16>, vector<147x64xbf16>, vector<256x64xf32> -> vector<256x64xf32>
    %c0_3 = arith.constant 0 : index
    %c0_4 = arith.constant 0 : index
    %3 = vector.load %arg4[%c0_3, %c0_4] : memref<1x64xf32, #tpu.memory_space<vmem>>, vector<1x64xf32>
    %4 = vector.broadcast %3 : vector<1x64xf32> to vector<256x64xf32>
    %5 = arith.addf %2, %4 : vector<256x64xf32>
    %cst_5 = arith.constant 0.000000e+00 : f32
    %6 = vector.broadcast %cst_5 : f32 to vector<256x64xf32>
    %7 = arith.maximumf %5, %6 : vector<256x64xf32>
    %8 = arith.truncf %7 : vector<256x64xf32> to vector<256x64xbf16>
    %c0_6 = arith.constant 0 : index
    %c0_7 = arith.constant 0 : index
    %9 = vector.load %arg5[%c0_6, %c0_7] : memref<256x64xbf16, #tpu.memory_space<vmem>>, vector<256x64xbf16>
    tpu.vector_store %arg5[%c0_6, %c0_7], %8 {strides = array<i32>} : memref<256x64xbf16, #tpu.memory_space<vmem>>, vector<256x64xbf16>,
    return
  }
  func.func @transform_0(%arg0: i32, %arg1: i32) -> (i32, i32) {
    %c0_i32 = arith.constant 0 : i32
    %c0_i32_0 = arith.constant 0 : i32
    return %arg0, %c0_i32 : i32, i32
  }
  func.func @transform_1(%arg0: i32, %arg1: i32) -> (i32, i32) {
    %c0_i32 = arith.constant 0 : i32
    %c0_i32_0 = arith.constant 0 : i32
    return %c0_i32, %arg1 : i32, i32
  }
  func.func @transform_2(%arg0: i32, %arg1: i32) -> (i32, i32) {
    %c0_i32 = arith.constant 0 : i32
    %c0_i32_0 = arith.constant 0 : i32
    return %c0_i32, %arg1 : i32, i32
  }
  func.func @transform_3(%arg0: i32, %arg1: i32) -> (i32, i32) {
    %c0_i32 = arith.constant 0 : i32
    return %arg0, %arg1 : i32, i32
  }
}

</mosaic_0001>

<bundles_post_ra>
// kernel: tpu_custom_call.1
= control target key start
LH: loop header
LB: loop body
LE: loop exit
PB: predicated region body
PF: predicated region fallthrough
CT: control target
= control target key end

     0   :  { %s1235_s12 = smov 0   ;;  %s1237_s13 = smov 0   ;;  %s1493_s0 = inlined_call_operand.vmem [shape: bf16[2048,147], index: 0, kind: input, shape index: {}]   ;;  %s1494_s1 = inlined_call_operand.vmem [shape: bf16[147,64], index: 1, kind: input, shape index: {}]   ;;  %s1495_s2 = inlined_call_operand.vmem [shape: f32[1,64], index: 2, kind: input, shape index: {}]   ;;  %s1496_s3 = inlined_call_operand.vmem [shape: bf16[2048,64], index: 3, kind: output, shape index: {}]  }
   0x1   :  { %s1239_s14 = smov 0  }
   0x2 LB: > { %s25_s15 = sadd.s32 1, %s1208_s13  ;;  %p924_p0 = scmp.ge.s32.totalorder %s1212_s14, 1  ;;  %s1212_s14 = sphi %s1239_s14, %s13_s14   ;;  %s1208_s13 = sphi %s1237_s13, %s1498_s13   ;;  %s1204_s12 = sphi %s1235_s12, %s1497_s12  }
   0x3   : > { %p27_p1 = scmp.ge.s32.totalorder %s25_s15, 8  ;;  %p170_p2 = scmp.lt.s32.totalorder %s1212_s14, 9 }
   0x5   : > { %s1500_s15 = smov (%p27_p1, %s25_s15), 0  ;;  %p171_p3 = pnand %p924_p0, %p170_p2 }
   0x6   : > { %s925_s20 = sshll.u32 (!%p171_p3), %s1204_s12, 5 }
   0x7   : > { %174 = sbr.rel (%p171_p3) target bundleno = 305 (0x131), region = 32  ;;  %p206_p4 = scmp.lt.s32.totalorder (!%p171_p3), %s925_s20, 255 }
   0xc   : > { %v1152_v0 = vld [vmem:[%s1494_s1 + $0x38] sm:$0xff]  ;;  %v279_v1 = vld [vmem:[%s1494_s1 + $0x48] sm:$0x3]  ;;  %vm534_vm0 = vcmask 1040384   ;;  %vm535_vm1 = vcmask 1041408   ;;  %v1151_v3 = vld [vmem:[%s1494_s1 + $0x30] sm:$0xff] }
   0xd   : > { %v465_v2 = vunpack.c.l.b16 %v279_v1  ;;  %541 = vmatpush.bf16.msra.mxu0 %v1152_v0  ;;  %1154 = vmatpush.bf16.msra.mxu2 %v1152_v0  ;;  %v1214_v4 = vmov 65535   ;;  %s1502_s20 = smov (!%p206_p4, %s925_s20), 255  ;;  %v1150_v9 = vld [vmem:[%s1494_s1 + $0x28] sm:$0xff]  ;;  %v1153_v10 = vld [vmem:[%s1494_s1 + $0x40] sm:$0xff]  ;;  %vm485_vm2 = vcmask 154624   ;;  %v1148_v18 = vld [vmem:[%s1494_s1 + $0x18] sm:$0xff] }
   0xe   : > { %v536_v5 = vsel %vm534_vm0, 4294967295, %v1214_v4  ;;  %s1112_s25 = sshll.u32 %s1502_s20, 3  ;;  %v1149_v14 = vld [vmem:[%s1494_s1 + $0x20] sm:$0xff]  ;;  %v1147_v19 = vld [vmem:[%s1494_s1 + $0x10] sm:$0xff]  ;;  %v1146_v20 = vld [vmem:[%s1494_s1 + $0x8] sm:$0xff]  ;;  %s929_s19 = sshll.u32 %s1502_s20, 2 }
   0xf   : > { %v475_v6 = vpack.c.b16 %v465_v2, %v465_v2  ;;  %v537_v7 = vsel %vm535_vm1, %v536_v5, 0  ;;  %s1274_s30 = scalar_lea.vmem %s1493_s0, %s1112_s25  ;;  %v1145_v26 = vld [vmem:[%s1494_s1] sm:$0xff]  ;;  %s1381_s23 = scalar_lea.vmem %s1496_s3, %s929_s19  ;;  %vm783_vm3 = vcmask 519168  }
  0x10   : > { %v1113_v11 = vld [vmem:[%s1274_s30 + $0x4] sm:$0xf]  ;;  %v934_v12 = vld [vmem:[%s1274_s30 + $0x8] sm:$0xf0]  ;;  %v1131_v15 = vld [vmem:[%s1274_s30 + $0x94] sm:$0xf] }
  0x11   : > { %v539_v8 = vand.u32 %v537_v7, %v475_v6  ;;  %542 = vmatpush.bf16.msra.mxu0 %v1151_v3  ;;  %1155 = vmatpush.bf16.msra.mxu2 %v1151_v3  ;;  %v937_v13 = vor.u32 %v1113_v11, %v934_v12  ;;  %v1006_v16 = vld [vmem:[%s1274_s30 + $0x98] sm:$0xf0]  ;;  %v1115_v21 = vld [vmem:[%s1274_s30 + $0x14] sm:$0xf]  ;;  %v1133_v23 = vld [vmem:[%s1274_s30 + $0xa4] sm:$0xf] }
  0x12   : > { %v1009_v17 = vor.u32 %v1131_v15, %v1006_v16  ;;  %v942_v22 = vld [vmem:[%s1274_s30 + $0x18] sm:$0xf0]  ;;  %v1014_v24 = vld [vmem:[%s1274_s30 + $0xa8] sm:$0xf0]  ;;  %v932_v27 = vld [vmem:[%s1274_s30] sm:$0xf] }
  0x13   : > { %636 = vmatpush.bf16.msra.mxu1 %v539_v8  ;;  %1162 = vmatpush.bf16.msra.mxu3 %v539_v8  ;;  %v945_v25 = vor.u32 %v1115_v21, %v942_v22  ;;  %v1114_v28 = vld [vmem:[%s1274_s30 + $0x4] sm:$0xf0]  ;;  %v996_v29 = vld [vmem:[%s1274_s30 + $0x80] sm:$0xf]  ;;  %v1017_v31 = vor.u32 %v1133_v23, %v1014_v24  ;;  %v1117_v34 = vld [vmem:[%s1274_s30 + $0x24] sm:$0xf] }
  0x14   : > { %v1130_v30 = vld [vmem:[%s1274_s30 + $0x84] sm:$0xf0]  ;;  %v933_v32 = vor.u32 %v1114_v28, %v932_v27  ;;  %v950_v35 = vld [vmem:[%s1274_s30 + $0x28] sm:$0xf0]  ;;  %v1135_v36 = vld [vmem:[%s1274_s30 + $0xb4] sm:$0xf] }
  0x15   : > { %543 = vmatpush.bf16.msra.mxu0 %v1150_v9  ;;  %1156 = vmatpush.bf16.msra.mxu2 %v1150_v9  ;;  %v997_v33 = vor.u32 %v1130_v30, %v996_v29  ;;  %v1022_v37 = vld [vmem:[%s1274_s30 + $0xb8] sm:$0xf0]  ;;  %v953_v38 = vor.u32 %v1117_v34, %v950_v35  ;;  %v940_v39 = vld [vmem:[%s1274_s30 + $0x10] sm:$0xf]  ;;  %v1116_v40 = vld [vmem:[%s1274_s30 + $0x14] sm:$0xf0] }
  0x16   : > { %v1004_v41 = vld [vmem:[%s1274_s30 + $0x90] sm:$0xf]  ;;  %v1132_v42 = vld [vmem:[%s1274_s30 + $0x94] sm:$0xf0]  ;;  %v1025_v43 = vor.u32 %v1135_v36, %v1022_v37  ;;  %v941_v44 = vor.u32 %v1116_v40, %v940_v39  ;;  %v1119_v46 = vld [vmem:[%s1274_s30 + $0x34] sm:$0xf] }
  0x17   : > { %637 = vmatpush.bf16.msra.mxu1 %v1153_v10  ;;  %1163 = vmatpush.bf16.msra.mxu3 %v1153_v10  ;;  %v1005_v45 = vor.u32 %v1132_v42, %v1004_v41  ;;  %v958_v47 = vld [vmem:[%s1274_s30 + $0x38] sm:$0xf0]  ;;  %v1137_v48 = vld [vmem:[%s1274_s30 + $0xc4] sm:$0xf]  ;;  %v1030_v49 = vld [vmem:[%s1274_s30 + $0xc8] sm:$0xf0] }
  0x18   : > { %v961_v50 = vor.u32 %v1119_v46, %v958_v47  ;;  %v948_v51 = vld [vmem:[%s1274_s30 + $0x20] sm:$0xf]  ;;  %v1118_v52 = vld [vmem:[%s1274_s30 + $0x24] sm:$0xf0]  ;;  %v1033_v55 = vor.u32 %v1137_v48, %v1030_v49  ;;  %v1121_v58 = vld [vmem:[%s1274_s30 + $0x44] sm:$0xf] }
  0x19   : > { %544 = vmatpush.bf16.msra.mxu0 %v1149_v14  ;;  %1157 = vmatpush.bf16.msra.mxu2 %v1149_v14  ;;  %v1012_v53 = vld [vmem:[%s1274_s30 + $0xa0] sm:$0xf]  ;;  %v1134_v54 = vld [vmem:[%s1274_s30 + $0xa4] sm:$0xf0]  ;;  %v949_v56 = vor.u32 %v1118_v52, %v948_v51  ;;  %v966_v59 = vld [vmem:[%s1274_s30 + $0x48] sm:$0xf0] }
  0x1a   : > { %1094 = vmatmul.msk.bf16.vlgmr.msra.gmra.mxu1 %vm485_vm2, %v937_v13  ;;  %1103 = vmatmul.msk.bf16.vlgmr.msra.gmra.mxu3 %vm485_vm2, %v1009_v17  ;;  %v1013_v57 = vor.u32 %v1134_v54, %v1012_v53  ;;  %v1139_v60 = vld [vmem:[%s1274_s30 + $0xd4] sm:$0xf]  ;;  %v1038_v61 = vld [vmem:[%s1274_s30 + $0xd8] sm:$0xf0]  ;;  %v969_v62 = vor.u32 %v1121_v58, %v966_v59  ;;  %v956_v63 = vld [vmem:[%s1274_s30 + $0x30] sm:$0xf] }
  0x1b   : > { %v1120_v0 = vld [vmem:[%s1274_s30 + $0x34] sm:$0xf0]  ;;  %v1020_v1 = vld [vmem:[%s1274_s30 + $0xb0] sm:$0xf]  ;;  %v1041_v3 = vor.u32 %v1139_v60, %v1038_v61  ;;  %v1123_v6 = vld [vmem:[%s1274_s30 + $0x54] sm:$0xf] }
  0x1c   : > { %v1136_v2 = vld [vmem:[%s1274_s30 + $0xb4] sm:$0xf0]  ;;  %v957_v4 = vor.u32 %v1120_v0, %v956_v63  ;;  %v974_v7 = vld [vmem:[%s1274_s30 + $0x58] sm:$0xf0]  ;;  %v1141_v8 = vld [vmem:[%s1274_s30 + $0xe4] sm:$0xf] }
  0x1d   : > { %545 = vmatpush.bf16.msra.mxu0 %v1148_v18  ;;  %1158 = vmatpush.bf16.msra.mxu2 %v1148_v18  ;;  %v1021_v5 = vor.u32 %v1136_v2, %v1020_v1  ;;  %v1046_v9 = vld [vmem:[%s1274_s30 + $0xe8] sm:$0xf0]  ;;  %v977_v10 = vor.u32 %v1123_v6, %v974_v7  ;;  %v964_v11 = vld [vmem:[%s1274_s30 + $0x40] sm:$0xf]  ;;  %v1122_v12 = vld [vmem:[%s1274_s30 + $0x44] sm:$0xf0] }
  0x1e   : > { %v1028_v13 = vld [vmem:[%s1274_s30 + $0xc0] sm:$0xf]  ;;  %v1138_v14 = vld [vmem:[%s1274_s30 + $0xc4] sm:$0xf0]  ;;  %v1049_v15 = vor.u32 %v1141_v8, %v1046_v9  ;;  %v965_v16 = vor.u32 %v1122_v12, %v964_v11  ;;  %v1125_v18 = vld [vmem:[%s1274_s30 + $0x64] sm:$0xf] }
  0x1f   : > { %v1029_v17 = vor.u32 %v1138_v14, %v1028_v13  ;;  %v1054_v21 = vld [vmem:[%s1274_s30 + $0xf8] sm:$0xf0]  ;;  %v972_v23 = vld [vmem:[%s1274_s30 + $0x50] sm:$0xf]  ;;  %v1124_v24 = vld [vmem:[%s1274_s30 + $0x54] sm:$0xf0] }
  0x20   : > { %v973_v28 = vor.u32 %v1124_v24, %v972_v23  ;;  %v1127_v30 = vld [vmem:[%s1274_s30 + $0x74] sm:$0xf]  ;;  %v1126_v34 = vld [vmem:[%s1274_s30 + $0x64] sm:$0xf0]  ;;  %v1044_v35 = vld [vmem:[%s1274_s30 + $0xe0] sm:$0xf] }
  0x21   : > { %546 = vmatpush.bf16.msra.mxu0 %v1147_v19  ;;  %1159 = vmatpush.bf16.msra.mxu2 %v1147_v19  ;;  %v982_v19 = vld [vmem:[%s1274_s30 + $0x68] sm:$0xf0]  ;;  %v1142_v36 = vld [vmem:[%s1274_s30 + $0xe4] sm:$0xf0]  ;;  %v1129_v39 = vld [vmem:[%s1274_s30 + $0x84] sm:$0xf] }
  0x22   : > { %v985_v22 = vor.u32 %v1125_v18, %v982_v19  ;;  %v998_v40 = vld [vmem:[%s1274_s30 + $0x88] sm:$0xf0]  ;;  %v988_v42 = vld [vmem:[%s1274_s30 + $0x70] sm:$0xf]  ;;  %v1144_v46 = vld [vmem:[%s1274_s30 + $0xf4] sm:$0xf0] }
  0x23   : > { %v1001_v41 = vor.u32 %v1129_v39, %v998_v40  ;;  %v1374_v51 = vld [vmem:[%s1495_s2] ss:$0 sm:$0xff] }
  0x25   : > { %547 = vmatpush.bf16.msra.mxu0 %v1146_v20  ;;  %1160 = vmatpush.bf16.msra.mxu2 %v1146_v20  ;;  %v1143_v20 = vld [vmem:[%s1274_s30 + $0xf4] sm:$0xf] }
  0x26   : > { %v1057_v27 = vor.u32 %v1143_v20, %v1054_v21 }
  0x29   : > { %548 = vmatpush.bf16.msra.mxu0 %v1145_v26  ;;  %1161 = vmatpush.bf16.msra.mxu2 %v1145_v26  ;;  %v1140_v26 = vld [vmem:[%s1274_s30 + $0xd4] sm:$0xf0] }
  0x2a   : > { %1095 = vmatmul.msk.bf16.gmra.mxu1 %vm485_vm2, %v945_v25  ;;  %1104 = vmatmul.msk.bf16.gmra.mxu3 %vm485_vm2, %v1017_v31  ;;  %v1036_v25 = vld [vmem:[%s1274_s30 + $0xd0] sm:$0xf]  ;;  %v990_v31 = vld [vmem:[%s1274_s30 + $0x78] sm:$0xf0] }
  0x2b   : > { %v1037_v29 = vor.u32 %v1140_v26, %v1036_v25 }
  0x2c   : > { %549 = vmatmul.bf16.vlgmr.msra.gmra.mxu0 %v933_v32  ;;  %589 = vmatmul.bf16.vlgmr.msra.gmra.mxu2 %v997_v33  ;;  %v993_v32 = vor.u32 %v1127_v30, %v990_v31  ;;  %v980_v33 = vld [vmem:[%s1274_s30 + $0x60] sm:$0xf] }
  0x2d   : > { %v981_v37 = vor.u32 %v1126_v34, %v980_v33 }
  0x3a   : > { %1096 = vmatmul.msk.bf16.gmra.mxu1 %vm485_vm2, %v953_v38  ;;  %1105 = vmatmul.msk.bf16.gmra.mxu3 %vm485_vm2, %v1025_v43  ;;  %v1045_v38 = vor.u32 %v1142_v36, %v1044_v35  ;;  %v1128_v43 = vld [vmem:[%s1274_s30 + $0x74] sm:$0xf0] }
  0x3b   : > { %v989_v47 = vor.u32 %v1128_v43, %v988_v42 }
  0x3c   : > { %554 = vmatmul.bf16.gmra.mxu0 %v941_v44  ;;  %594 = vmatmul.bf16.gmra.mxu2 %v1005_v45  ;;  %v1052_v45 = vld [vmem:[%s1274_s30 + $0xf0] sm:$0xf] }
  0x3d   : > { %v1053_v48 = vor.u32 %v1144_v46, %v1052_v45 }
  0x4a   : > { %1097 = vmatmul.msk.bf16.gmra.mxu1 %vm485_vm2, %v961_v50  ;;  %1106 = vmatmul.msk.bf16.gmra.mxu3 %vm485_vm2, %v1033_v55 }
  0x4c   : > { %559 = vmatmul.bf16.gmra.mxu0 %v949_v56  ;;  %599 = vmatmul.bf16.gmra.mxu2 %v1013_v57 }
  0x5a   : > { %1098 = vmatmul.msk.bf16.gmra.mxu1 %vm485_vm2, %v969_v62  ;;  %1107 = vmatmul.msk.bf16.gmra.mxu3 %vm485_vm2, %v1041_v3 }
  0x5c   : > { %564 = vmatmul.bf16.gmra.mxu0 %v957_v4  ;;  %604 = vmatmul.bf16.gmra.mxu2 %v1021_v5 }
  0x6a   : > { %1099 = vmatmul.msk.bf16.gmra.mxu1 %vm485_vm2, %v977_v10  ;;  %1108 = vmatmul.msk.bf16.gmra.mxu3 %vm485_vm2, %v1049_v15 }
  0x6c   : > { %569 = vmatmul.bf16.gmra.mxu0 %v965_v16  ;;  %609 = vmatmul.bf16.gmra.mxu2 %v1029_v17 }
  0x7a   : > { %1100 = vmatmul.msk.bf16.gmra.mxu1 %vm485_vm2, %v985_v22  ;;  %1109 = vmatmul.msk.bf16.gmra.mxu3 %vm485_vm2, %v1057_v27 }
  0x7c   : > { %574 = vmatmul.bf16.gmra.mxu0 %v973_v28  ;;  %614 = vmatmul.bf16.gmra.mxu2 %v1037_v29 }
  0x8a   : > { %1101 = vmatmul.msk.bf16.gmra.mxu1 %vm485_vm2, %v993_v32 }
  0x8c   : > { %579 = vmatmul.bf16.gmra.mxu0 %v981_v37  ;;  %619 = vmatmul.bf16.gmra.mxu2 %v1045_v38 }
  0x97   : > { %v639_v44 = vpop.f32.mrf.mxu1 }
  0x9a   : > { %1102 = vmatmul.msk.bf16.gmra.mxu1 %vm485_vm2, %v1001_v41 }
  0x9c   : > { %584 = vmatmul.bf16.gmra.mxu0 %v989_v47  ;;  %624 = vmatmul.bf16.gmra.mxu2 %v1053_v48 }
  0x9d   : > { %v684_v52 = vpop.f32.mrf.mxu3 }
  0x9f   : > { %v641_v49 = vpop.f32.mrf.mxu1 }
  0xa5   : > { %v686_v62 = vpop.f32.mrf.mxu3 }
  0xa7   : > { %v644_v50 = vpop.f32.mrf.mxu1 }
  0xa9   : > { %v550_v53 = vpop.f32.mrf.mxu0 }
  0xaa   : > { %v551_v54 = vadd.f32 %v1374_v51, %v550_v53 }
  0xac   : > { %v640_v55 = vadd.f32 %v639_v44, %v551_v54 }
  0xad   : > { %v689_v7 = vpop.f32.mrf.mxu3 }
  0xae   : > { %v719_v56 = vmax.f32 %v640_v55, 0.0 }
  0xaf   : > { %v646_v57 = vpop.f32.mrf.mxu1  ;;  %v1383_v59 = vpop.f32.mrf.mxu2 }
  0xb0   : > { %v751_v58 = vpack.c.bf16 %v719_v56, %v719_v56 }
  0xb1   : > { %v552_v60 = vpop.f32.mrf.mxu0 }
  0xb2   : > { %784 = vst.msk [vmem:[%s1381_s23] sm:$0xf] %vm783_vm3, %v751_v58  ;;  %v553_v61 = vadd.f32 %v1374_v51, %v552_v60 }
  0xb4   : > { %v642_v63 = vadd.f32 %v641_v49, %v553_v61 }
  0xb5   : > { %v691_v20 = vpop.f32.mrf.mxu3 }
  0xb6   : > { %v720_v0 = vmax.f32 %v642_v63, 0.0 }
  0xb7   : > { %v649_v1 = vpop.f32.mrf.mxu1  ;;  %v1388_v3 = vpop.f32.mrf.mxu2 }
  0xb8   : > { %v752_v2 = vpack.c.bf16 %v720_v0, %v720_v0 }
  0xb9   : > { %v555_v4 = vpop.f32.mrf.mxu0 }
  0xba   : > { %785 = vst.msk [vmem:[%s1381_s23 + $0x4] sm:$0xf] %vm783_vm3, %v752_v2  ;;  %v556_v5 = vadd.f32 %v1374_v51, %v555_v4 }
  0xbc   : > { %v645_v6 = vadd.f32 %v644_v50, %v556_v5 }
  0xbd   : > { %v694_v35 = vpop.f32.mrf.mxu3 }
  0xbe   : > { %v721_v8 = vmax.f32 %v645_v6, 0.0 }
  0xbf   : > { %v651_v9 = vpop.f32.mrf.mxu1  ;;  %v595_v11 = vpop.f32.mrf.mxu2 }
  0xc0   : > { %v753_v10 = vpack.c.bf16 %v721_v8, %v721_v8  ;;  %v596_v12 = vadd.f32 %v1374_v51, %v595_v11 }
  0xc1   : > { %v557_v13 = vpop.f32.mrf.mxu0 }
  0xc2   : > { %786 = vst.msk [vmem:[%s1381_s23 + $0x8] sm:$0xf] %vm783_vm3, %v753_v10  ;;  %v558_v14 = vadd.f32 %v1374_v51, %v557_v13  ;;  %v685_v15 = vadd.f32 %v684_v52, %v596_v12 }
  0xc4   : > { %v647_v16 = vadd.f32 %v646_v57, %v558_v14  ;;  %v737_v17 = vmax.f32 %v685_v15, 0.0 }
  0xc5   : > { %v696_v50 = vpop.f32.mrf.mxu3 }
  0xc6   : > { %v722_v18 = vmax.f32 %v647_v16, 0.0  ;;  %v769_v21 = vpack.c.bf16 %v737_v17, %v737_v17 }
  0xc7   : > { %v654_v19 = vpop.f32.mrf.mxu1  ;;  %v597_v23 = vpop.f32.mrf.mxu2 }
  0xc8   : > { %v754_v22 = vpack.c.bf16 %v722_v18, %v722_v18  ;;  %802 = vst.msk [vmem:[%s1381_s23 + $0x48] sm:$0xf] %vm783_vm3, %v769_v21  ;;  %v598_v24 = vadd.f32 %v1374_v51, %v597_v23 }
  0xc9   : > { %v560_v25 = vpop.f32.mrf.mxu0 }
  0xca   : > { %787 = vst.msk [vmem:[%s1381_s23 + $0xc] sm:$0xf] %vm783_vm3, %v754_v22  ;;  %v561_v26 = vadd.f32 %v1374_v51, %v560_v25  ;;  %v687_v27 = vadd.f32 %v686_v62, %v598_v24 }
  0xcc   : > { %v650_v28 = vadd.f32 %v649_v1, %v561_v26  ;;  %v738_v29 = vmax.f32 %v687_v27, 0.0 }
  0xcd   : > { %v699_v2 = vpop.f32.mrf.mxu3 }
  0xce   : > { %v723_v30 = vmax.f32 %v650_v28, 0.0  ;;  %v770_v32 = vpack.c.bf16 %v738_v29, %v738_v29 }
  0xcf   : > { %v656_v31 = vpop.f32.mrf.mxu1  ;;  %v600_v34 = vpop.f32.mrf.mxu2 }
  0xd0   : > { %v755_v33 = vpack.c.bf16 %v723_v30, %v723_v30  ;;  %803 = vst.msk [vmem:[%s1381_s23 + $0x4c] sm:$0xf] %vm783_vm3, %v770_v32  ;;  %v601_v36 = vadd.f32 %v1374_v51, %v600_v34 }
  0xd1   : > { %v562_v37 = vpop.f32.mrf.mxu0 }
  0xd2   : > { %788 = vst.msk [vmem:[%s1381_s23 + $0x10] sm:$0xf] %vm783_vm3, %v755_v33  ;;  %v563_v38 = vadd.f32 %v1374_v51, %v562_v37  ;;  %v690_v39 = vadd.f32 %v689_v7, %v601_v36 }
  0xd4   : > { %v652_v40 = vadd.f32 %v651_v9, %v563_v38  ;;  %v739_v41 = vmax.f32 %v690_v39, 0.0 }
  0xd5   : > { %v701_v18 = vpop.f32.mrf.mxu3 }
  0xd6   : > { %v724_v42 = vmax.f32 %v652_v40, 0.0  ;;  %v771_v44 = vpack.c.bf16 %v739_v41, %v739_v41 }
  0xd7   : > { %v659_v43 = vpop.f32.mrf.mxu1  ;;  %v602_v46 = vpop.f32.mrf.mxu2 }
  0xd8   : > { %v756_v45 = vpack.c.bf16 %v724_v42, %v724_v42  ;;  %804 = vst.msk [vmem:[%s1381_s23 + $0x50] sm:$0xf] %vm783_vm3, %v771_v44  ;;  %v603_v47 = vadd.f32 %v1374_v51, %v602_v46 }
  0xd9   : > { %v565_v48 = vpop.f32.mrf.mxu0 }
  0xda   : > { %789 = vst.msk [vmem:[%s1381_s23 + $0x14] sm:$0xf] %vm783_vm3, %v756_v45  ;;  %v566_v49 = vadd.f32 %v1374_v51, %v565_v48  ;;  %v692_v52 = vadd.f32 %v691_v20, %v603_v47 }
  0xdc   : > { %v655_v53 = vadd.f32 %v654_v19, %v566_v49  ;;  %v740_v54 = vmax.f32 %v692_v52, 0.0 }
  0xdd   : > { %v704_v33 = vpop.f32.mrf.mxu3 }
  0xde   : > { %v725_v55 = vmax.f32 %v655_v53, 0.0  ;;  %v772_v57 = vpack.c.bf16 %v740_v54, %v740_v54 }
  0xdf   : > { %v661_v56 = vpop.f32.mrf.mxu1  ;;  %v605_v60 = vpop.f32.mrf.mxu2 }
  0xe0   : > { %v757_v58 = vpack.c.bf16 %v725_v55, %v725_v55  ;;  %805 = vst.msk [vmem:[%s1381_s23 + $0x54] sm:$0xf] %vm783_vm3, %v772_v57  ;;  %v606_v61 = vadd.f32 %v1374_v51, %v605_v60 }
  0xe1   : > { %v567_v62 = vpop.f32.mrf.mxu0 }
  0xe2   : > { %790 = vst.msk [vmem:[%s1381_s23 + $0x18] sm:$0xf] %vm783_vm3, %v757_v58  ;;  %v568_v63 = vadd.f32 %v1374_v51, %v567_v62  ;;  %v695_v0 = vadd.f32 %v694_v35, %v606_v61 }
  0xe4   : > { %v657_v1 = vadd.f32 %v656_v31, %v568_v63  ;;  %v741_v4 = vmax.f32 %v695_v0, 0.0 }
  0xe5   : > { %v706_v48 = vpop.f32.mrf.mxu3 }
  0xe6   : > { %v726_v5 = vmax.f32 %v657_v1, 0.0  ;;  %v773_v7 = vpack.c.bf16 %v741_v4, %v741_v4 }
  0xe7   : > { %v664_v6 = vpop.f32.mrf.mxu1  ;;  %v607_v9 = vpop.f32.mrf.mxu2 }
  0xe8   : > { %v758_v8 = vpack.c.bf16 %v726_v5, %v726_v5  ;;  %806 = vst.msk [vmem:[%s1381_s23 + $0x58] sm:$0xf] %vm783_vm3, %v773_v7  ;;  %v608_v10 = vadd.f32 %v1374_v51, %v607_v9 }
  0xe9   : > { %v570_v11 = vpop.f32.mrf.mxu0 }
  0xea   : > { %791 = vst.msk [vmem:[%s1381_s23 + $0x1c] sm:$0xf] %vm783_vm3, %v758_v8  ;;  %v571_v12 = vadd.f32 %v1374_v51, %v570_v11  ;;  %v697_v13 = vadd.f32 %v696_v50, %v608_v10 }
  0xec   : > { %v660_v14 = vadd.f32 %v659_v43, %v571_v12  ;;  %v742_v15 = vmax.f32 %v697_v13, 0.0  ;;  %v591_v13 = vadd.f32 %v1374_v51, %v1383_v59 }
  0xed   : > { %v709_v0 = vpop.f32.mrf.mxu3 }
  0xee   : > { %v727_v16 = vmax.f32 %v660_v14, 0.0  ;;  %v774_v19 = vpack.c.bf16 %v742_v15, %v742_v15 }
  0xef   : > { %v666_v17 = vpop.f32.mrf.mxu1  ;;  %v610_v21 = vpop.f32.mrf.mxu2 }
  0xf0   : > { %v759_v20 = vpack.c.bf16 %v727_v16, %v727_v16  ;;  %807 = vst.msk [vmem:[%s1381_s23 + $0x5c] sm:$0xf] %vm783_vm3, %v774_v19  ;;  %v611_v22 = vadd.f32 %v1374_v51, %v610_v21 }
  0xf1   : > { %v572_v23 = vpop.f32.mrf.mxu0 }
  0xf2   : > { %792 = vst.msk [vmem:[%s1381_s23 + $0x20] sm:$0xf] %vm783_vm3, %v759_v20  ;;  %v573_v24 = vadd.f32 %v1374_v51, %v572_v23  ;;  %v700_v25 = vadd.f32 %v699_v2, %v611_v22 }
  0xf4   : > { %v662_v26 = vadd.f32 %v661_v56, %v573_v24  ;;  %v743_v27 = vmax.f32 %v700_v25, 0.0 }
  0xf5   : > { %v711_v16 = vpop.f32.mrf.mxu3 }
  0xf6   : > { %v728_v28 = vmax.f32 %v662_v26, 0.0  ;;  %v775_v30 = vpack.c.bf16 %v743_v27, %v743_v27 }
  0xf7   : > { %v669_v29 = vpop.f32.mrf.mxu1  ;;  %v612_v32 = vpop.f32.mrf.mxu2 }
  0xf8   : > { %v760_v31 = vpack.c.bf16 %v728_v28, %v728_v28  ;;  %808 = vst.msk [vmem:[%s1381_s23 + $0x60] sm:$0xf] %vm783_vm3, %v775_v30  ;;  %v613_v34 = vadd.f32 %v1374_v51, %v612_v32  ;;  %v593_v28 = vadd.f32 %v1374_v51, %v1388_v3 }
  0xf9   : > { %v575_v35 = vpop.f32.mrf.mxu0 }
  0xfa   : > { %793 = vst.msk [vmem:[%s1381_s23 + $0x24] sm:$0xf] %vm783_vm3, %v760_v31  ;;  %v576_v36 = vadd.f32 %v1374_v51, %v575_v35  ;;  %v702_v37 = vadd.f32 %v701_v18, %v613_v34 }
  0xfc   : > { %v665_v38 = vadd.f32 %v664_v6, %v576_v36  ;;  %v744_v39 = vmax.f32 %v702_v37, 0.0 }
  0xfd   : > { %v714_v35 = vpop.f32.mrf.mxu3 }
  0xfe   : > { %v729_v40 = vmax.f32 %v665_v38, 0.0  ;;  %v776_v42 = vpack.c.bf16 %v744_v39, %v744_v39 }
  0xff   : > { %v671_v41 = vpop.f32.mrf.mxu1  ;;  %v615_v44 = vpop.f32.mrf.mxu2 }
 0x100   : > { %v761_v43 = vpack.c.bf16 %v729_v40, %v729_v40  ;;  %809 = vst.msk [vmem:[%s1381_s23 + $0x64] sm:$0xf] %vm783_vm3, %v776_v42  ;;  %v616_v45 = vadd.f32 %v1374_v51, %v615_v44 }
 0x101   : > { %v577_v46 = vpop.f32.mrf.mxu0 }
 0x102   : > { %794 = vst.msk [vmem:[%s1381_s23 + $0x28] sm:$0xf] %vm783_vm3, %v761_v43  ;;  %v578_v47 = vadd.f32 %v1374_v51, %v577_v46  ;;  %v705_v49 = vadd.f32 %v704_v33, %v616_v45 }
 0x104   : > { %v667_v50 = vadd.f32 %v666_v17, %v578_v47  ;;  %v745_v52 = vmax.f32 %v705_v49, 0.0 }
 0x105   : > { %v716_v49 = vpop.f32.mrf.mxu3 }
 0x106   : > { %v730_v53 = vmax.f32 %v667_v50, 0.0  ;;  %v777_v55 = vpack.c.bf16 %v745_v52, %v745_v52 }
 0x107   : > { %v674_v54 = vpop.f32.mrf.mxu1  ;;  %v617_v57 = vpop.f32.mrf.mxu2 }
 0x108   : > { %v762_v56 = vpack.c.bf16 %v730_v53, %v730_v53  ;;  %810 = vst.msk [vmem:[%s1381_s23 + $0x68] sm:$0xf] %vm783_vm3, %v777_v55  ;;  %v618_v58 = vadd.f32 %v1374_v51, %v617_v57 }
 0x109   : > { %v580_v60 = vpop.f32.mrf.mxu0 }
 0x10a   : > { %795 = vst.msk [vmem:[%s1381_s23 + $0x2c] sm:$0xf] %vm783_vm3, %v762_v56  ;;  %v581_v61 = vadd.f32 %v1374_v51, %v580_v60  ;;  %v707_v62 = vadd.f32 %v706_v48, %v618_v58 }
 0x10c   : > { %v670_v63 = vadd.f32 %v669_v29, %v581_v61  ;;  %v746_v1 = vmax.f32 %v707_v62, 0.0 }
 0x10e   : > { %v731_v2 = vmax.f32 %v670_v63, 0.0  ;;  %v778_v5 = vpack.c.bf16 %v746_v1, %v746_v1 }
 0x10f   : > { %v676_v4 = vpop.f32.mrf.mxu1  ;;  %v620_v7 = vpop.f32.mrf.mxu2 }
 0x110   : > { %v763_v6 = vpack.c.bf16 %v731_v2, %v731_v2  ;;  %811 = vst.msk [vmem:[%s1381_s23 + $0x6c] sm:$0xf] %vm783_vm3, %v778_v5  ;;  %v621_v8 = vadd.f32 %v1374_v51, %v620_v7 }
 0x111   : > { %v582_v9 = vpop.f32.mrf.mxu0 }
 0x112   : > { %796 = vst.msk [vmem:[%s1381_s23 + $0x30] sm:$0xf] %vm783_vm3, %v763_v6  ;;  %v583_v10 = vadd.f32 %v1374_v51, %v582_v9  ;;  %v710_v11 = vadd.f32 %v709_v0, %v621_v8 }
 0x114   : > { %v672_v12 = vadd.f32 %v671_v41, %v583_v10  ;;  %v747_v14 = vmax.f32 %v710_v11, 0.0 }
 0x116   : > { %v732_v15 = vmax.f32 %v672_v12, 0.0  ;;  %v779_v18 = vpack.c.bf16 %v747_v14, %v747_v14 }
 0x117   : > { %v679_v17 = vpop.f32.mrf.mxu1  ;;  %v622_v21 = vpop.f32.mrf.mxu2 }
 0x118   : > { %v680_v19 = vadd.f32 %v679_v17, %v591_v13  ;;  %v764_v20 = vpack.c.bf16 %v732_v15, %v732_v15  ;;  %812 = vst.msk [vmem:[%s1381_s23 + $0x70] sm:$0xf] %vm783_vm3, %v779_v18  ;;  %v623_v23 = vadd.f32 %v1374_v51, %v622_v21 }
 0x119   : > { %v585_v24 = vpop.f32.mrf.mxu0 }
 0x11a   : > { %v735_v22 = vmax.f32 %v680_v19, 0.0  ;;  %797 = vst.msk [vmem:[%s1381_s23 + $0x34] sm:$0xf] %vm783_vm3, %v764_v20  ;;  %v586_v59 = vadd.f32 %v1374_v51, %v585_v24  ;;  %v712_v26 = vadd.f32 %v711_v16, %v623_v23 }
 0x11c   : > { %v767_v25 = vpack.c.bf16 %v735_v22, %v735_v22  ;;  %v675_v27 = vadd.f32 %v674_v54, %v586_v59  ;;  %v748_v29 = vmax.f32 %v712_v26, 0.0 }
 0x11e   : > { %800 = vst.msk [vmem:[%s1381_s23 + $0x40] sm:$0xf] %vm783_vm3, %v767_v25  ;;  %v733_v30 = vmax.f32 %v675_v27, 0.0  ;;  %v780_v32 = vpack.c.bf16 %v748_v29, %v748_v29 }
 0x11f   : > { %v681_v31 = vpop.f32.mrf.mxu1  ;;  %v625_v36 = vpop.f32.mrf.mxu2 }
 0x120   : > { %v682_v33 = vadd.f32 %v681_v31, %v593_v28  ;;  %v765_v34 = vpack.c.bf16 %v733_v30, %v733_v30  ;;  %813 = vst.msk [vmem:[%s1381_s23 + $0x74] sm:$0xf] %vm783_vm3, %v780_v32  ;;  %v626_v38 = vadd.f32 %v1374_v51, %v625_v36 }
 0x121   : > { %v587_v39 = vpop.f32.mrf.mxu0 }
 0x122   : > { %v736_v37 = vmax.f32 %v682_v33, 0.0  ;;  %798 = vst.msk [vmem:[%s1381_s23 + $0x38] sm:$0xf] %vm783_vm3, %v765_v34  ;;  %v588_v3 = vadd.f32 %v1374_v51, %v587_v39  ;;  %v715_v41 = vadd.f32 %v714_v35, %v626_v38 }
 0x124   : > { %v768_v40 = vpack.c.bf16 %v736_v37, %v736_v37  ;;  %v677_v42 = vadd.f32 %v676_v4, %v588_v3  ;;  %v749_v43 = vmax.f32 %v715_v41, 0.0 }
 0x126   : > { %801 = vst.msk [vmem:[%s1381_s23 + $0x44] sm:$0xf] %vm783_vm3, %v768_v40  ;;  %v734_v44 = vmax.f32 %v677_v42, 0.0  ;;  %v781_v45 = vpack.c.bf16 %v749_v43, %v749_v43 }
 0x127   : > { %v627_v47 = vpop.f32.mrf.mxu2 }
 0x128   : > { %v766_v46 = vpack.c.bf16 %v734_v44, %v734_v44  ;;  %814 = vst.msk [vmem:[%s1381_s23 + $0x78] sm:$0xf] %vm783_vm3, %v781_v45  ;;  %v628_v48 = vadd.f32 %v1374_v51, %v627_v47 }
 0x12a   : > { %799 = vst.msk [vmem:[%s1381_s23 + $0x3c] sm:$0xf] %vm783_vm3, %v766_v46  ;;  %v717_v50 = vadd.f32 %v716_v49, %v628_v48 }
 0x12c   : > { %v750_v52 = vmax.f32 %v717_v50, 0.0 }
 0x12e   : > { %v782_v53 = vpack.c.bf16 %v750_v52, %v750_v52 }
 0x130   : > { %815 = vst.msk [vmem:[%s1381_s23 + $0x7c] sm:$0xf] %vm783_vm3, %v782_v53 }
 0x131 PF: > { %s13_s14 = sadd.s32 1, %s1212_s14   ;;  %s1497_s12 = smov %s1208_s13 }
 0x132   : > { %p10_p5 = scmp.ge.s32.totalorder %s13_s14, 10   ;;  %s1498_s13 = smov %s1500_s15 }
 0x134   :  { %12 = sbr.rel (!%p10_p5) target bundleno = 2 (0x2), region = 68 }

</bundles_post_ra>
